<compile_context>
chip_gen: v7x
topology: tpu7x:2x2x1
jax: 0.10.0
libtpu: 0.0.40
codegen_flags: <defaults>
</compile_context>

<pallas_src>
import numpy as np
import jax
import jax.numpy as jnp
from jax.experimental import pallas as pl
from jax.experimental.pallas import tpu as pltpu


def _custom_act(x):
    # CustomActivation: (|x+1| - |x-1|) / 2  (hardtanh, kept literal)
    return (jnp.abs(x + 1.0) - jnp.abs(x - 1.0)) * 0.5


# ---------------------------------------------------------------------------
# Fused kernel: fc0 -> split_input -> per-channel (Wp, Linear, act)x2 pipeline
# -> fc1, all on lane-dense 2-D VMEM tiles.
# Pipeline tile layout: P[i, k*w + j] == channel-k slab element [i, j].
# ---------------------------------------------------------------------------
def _candy_fused_kernel(a_in_ref, b_w0_ref, b0_ref, actmask_ref,
                        wp_ref, wzp_ref, wlp_ref, blp_ref,
                        wlz_ref, blz_ref, b1m_ref, b1b_ref, o_ref):
    f32 = jnp.float32
    # fc0 (+ the .view(hc,h,w) scramble folded into b_w0): (h, w*cin)@(w*cin, hc*w)
    p = jnp.dot(a_in_ref[...], b_w0_ref[...], preferred_element_type=f32)
    p = (p + b0_ref[...]) * actmask_ref[...]            # split_input: x * act(p_mask)

    # p branch: Wp @ p_set -> act -> Linear(w,w) (block-diag) -> act
    t = jnp.dot(wp_ref[...], p, preferred_element_type=f32)
    t = _custom_act(t)
    t = jnp.dot(t, wlp_ref[...], preferred_element_type=f32) + blp_ref[...]
    t = _custom_act(t)                                   # p_output

    # z branch: Wzp @ p_output -> act -> Linear(w,w) -> act
    z = jnp.dot(wzp_ref[...], t, preferred_element_type=f32)
    z = _custom_act(z)
    z = jnp.dot(z, wlz_ref[...], preferred_element_type=f32) + blz_ref[...]
    z = _custom_act(z)                                   # z_output

    c = t + z                                            # combined_output

    # fc1 (+ final .view permutation folded into b1m): (h, hc*w)@(hc*w, oc*w)
    o_ref[...] = jnp.dot(c, b1m_ref[...], preferred_element_type=f32) + b1b_ref[...]


def _fused_call(a_in, prep):
    h = a_in.shape[0]
    ncols = prep["b1_mat"].shape[1]
    vmem = pl.BlockSpec(memory_space=pltpu.MemorySpace.VMEM)
    return pl.pallas_call(
        _candy_fused_kernel,
        out_shape=jax.ShapeDtypeStruct((h, ncols), jnp.float32),
        in_specs=[vmem] * 12,
        out_specs=vmem,
    )(a_in, prep["b_w0"], prep["b0_t"], prep["actmask_t"],
      prep["wp_eff"], prep["wzp"], prep["wlp_bd"], prep["blp_t"],
      prep["wlz_bd"], prep["blz_t"], prep["b1_mat"], prep["b1_t"])


# ---------------------------------------------------------------------------
# One-time, parameter-only restructuring (outside the hot path).
# Reproduces, exactly, the flat row-major .view() semantics of the reference.
# ---------------------------------------------------------------------------
def prepare_candy(params, cfg):
    cin, hc, oc = cfg["in_channel"], cfg["hidden_channel"], cfg["out_channel"]
    w, h = cfg["input_size"], cfg["hidden_size"]
    N = h * w
    f32 = jnp.float32

    # ---- stage 1: fc0 + x.view(hc,h,w), produced directly in (h, hc*w) layout ----
    # P[i, q] (q = k*w + j) pulls the fc0-output flat element  k*N + i*w + j.
    i_idx = np.arange(h)[:, None]
    q_idx = np.arange(hc * w)[None, :]
    p_flat = (q_idx // w) * N + i_idx * w + (q_idx % w)
    n_mat = p_flat // hc                 # fc0 input row (spatial position) needed
    m_mat = p_flat % hc                  # fc0 output channel needed
    assert np.all(m_mat == m_mat[:1, :]), "requires hidden_channel | input_size"
    m_q = m_mat[0]
    base_q = n_mat[0]
    delta_i = n_mat[:, 0] - n_mat[0, 0]
    assert np.all(n_mat == delta_i[:, None] + base_q[None, :])
    ub, t_q = np.unique(base_q, return_inverse=True)
    U = ub.shape[0]
    a_rows = (delta_i[:, None] + ub[None, :]).reshape(-1)       # (h*U,) gather rows of x

    w0 = params["fc0_w"]                                        # (hc, cin) torch layout
    r = np.arange(U * cin)
    big = w0.T[r % cin][:, m_q]                                 # (U*cin, hc*w)
    b_w0 = jnp.where(jnp.asarray((r // cin)[:, None] == t_q[None, :]), big, 0.0).astype(f32)
    b0_t = params["fc0_b"][m_q][None, :].astype(f32)            # (1, hc*w)

    # split_input mask: activate once, tile across channels
    actmask_t = jnp.tile(_custom_act(params["p_mask"]), (1, hc)).astype(f32)

    # ---- per-channel pipeline weights ----
    wp = jnp.tril(params["Wp"])                                 # literal tril + diag clamp
    d = jnp.diag(wp)
    wp = wp - jnp.diag(d) + jnp.diag(jnp.clip(d, 0.0, 1.0))
    wp_eff = (wp + jnp.diag(params["Wp_diag"])).astype(f32)
    wzp = params["Wzp"].astype(f32)
    eye_hc = jnp.eye(hc, dtype=f32)
    wlp_bd = jnp.kron(eye_hc, params["p_lin_w"].T).astype(f32)  # (hc*w, hc*w) block-diag
    wlz_bd = jnp.kron(eye_hc, params["z_lin_w"].T).astype(f32)
    blp_t = jnp.tile(params["p_lin_b"], hc)[None, :].astype(f32)
    blz_t = jnp.tile(params["z_lin_b"], hc)[None, :].astype(f32)

    # ---- stage 3: combined.view(h,w,hc) -> fc1 -> output.view(b,oc,h,w) ----
    e = np.arange(oc * N)                   # flat index of the final (oc, h, w) output
    a_e = e // (w * oc)
    b_e = (e % (w * oc)) // oc
    oidx_e = e % oc
    g0 = a_e * (w * hc) + b_e * hc          # flat index into combined (hc,h,w), m = 0

    def g_to_rc(g):                         # combined flat index -> (row, col) of C2d
        return (g % N) // w, (g // N) * w + (g % w)

    rows_e = g_to_rc(g0)[0]
    for m in range(hc):
        assert np.all(g_to_rc(g0 + m)[0] == rows_e), "requires hidden_channel | input_size"

    out_row = rows_e
    out_col = np.zeros(oc * N, dtype=np.int64)
    colc_ref, oidx_ref = None, None
    for rr in range(h):
        es = np.nonzero(rows_e == rr)[0]
        out_col[es] = np.arange(es.size)
        colc = np.stack([g_to_rc(g0[es] + m)[1] for m in range(hc)], axis=1)
        oid = oidx_e[es]
        if colc_ref is None:
            colc_ref, oidx_ref = colc, oid
        else:
            assert np.all(colc == colc_ref) and np.all(oid == oidx_ref)
    ncols = colc_ref.shape[0]
    assert ncols * h == oc * N

    w1 = params["fc1_w"]                                        # (oc, hc)
    vals = w1[oidx_ref].reshape(-1)                             # (ncols*hc,)
    b1_mat = jnp.zeros((hc * w, ncols), f32).at[
        colc_ref.reshape(-1), np.repeat(np.arange(ncols), hc)].add(vals)
    b1_t = params["fc1_b"][oidx_ref][None, :].astype(f32)

    return dict(a_rows=a_rows, a_cols=U * cin,
                b_w0=b_w0, b0_t=b0_t, actmask_t=actmask_t,
                wp_eff=wp_eff, wzp=wzp,
                wlp_bd=wlp_bd, blp_t=blp_t, wlz_bd=wlz_bd, blz_t=blz_t,
                b1_mat=b1_mat, b1_t=b1_t,
                out_row=out_row, out_col=out_col)


def candy_forward(x, prep, cfg):
    origin = x
    cin, oc = cfg["in_channel"], cfg["out_channel"]
    w, h = cfg["input_size"], cfg["hidden_size"]
    N = h * w

    # x.view(cin,h,w).view(h,w,cin) are flat reinterprets: the fc0 input matrix
    # is the flat buffer reshaped to (h*w, cin); the gather reorders its rows so
    # the in-kernel fc0 directly yields the lane-dense (h, hc*w) pipeline tile.
    xm = x.reshape(N, cin)
    a_in = xm[prep["a_rows"], :].reshape(h, prep["a_cols"])

    outfin = _fused_call(a_in, prep)                    # (h, oc*w) lane-dense result

    # undo the fc1 / final-.view permutation (tiny gather)
    out_flat = outfin[prep["out_row"], prep["out_col"]]
    # TODO(synk): the reference's final .view is only valid for batch_size == 1.
    out = out_flat.reshape(cfg["batch_size"], oc, h, w)
    return out, origin


# ---------------------------------------------------------------------------
# Pure-JAX literal port of the PyTorch forward (for validation).
# ---------------------------------------------------------------------------
def candy_reference(x, params, cfg):
    cin, hc, oc = cfg["in_channel"], cfg["hidden_channel"], cfg["out_channel"]
    w, h = cfg["input_size"], cfg["hidden_size"]
    N = h * w
    hi = "highest"
    xm = x.reshape(N, cin)
    m = jnp.dot(xm, params["fc0_w"].T, precision=hi) + params["fc0_b"]
    x_hc = m.reshape(hc, h, w)
    p_set = x_hc * _custom_act(params["p_mask"])[None]
    wp = jnp.tril(params["Wp"])
    d = jnp.diag(wp)
    wp = wp - jnp.diag(d) + jnp.diag(jnp.clip(d, 0.0, 1.0))
    wp_eff = wp + jnp.diag(params["Wp_diag"])
    outs = []
    for k in range(hc):
        tp = jnp.dot(wp_eff, p_set[k], precision=hi)
        tp = _custom_act(tp)
        tp = jnp.dot(tp, params["p_lin_w"].T, precision=hi) + params["p_lin_b"]
        tp = _custom_act(tp)
        tz = jnp.dot(params["Wzp"], tp, precision=hi)
        tz = _custom_act(tz)
        tz = jnp.dot(tz, params["z_lin_w"].T, precision=hi) + params["z_lin_b"]
        tz = _custom_act(tz)
        outs.append(tp + tz)
    combined = jnp.stack(outs, 0).reshape(h, w, hc)
    out = jnp.dot(combined.reshape(N, hc), params["fc1_w"].T, precision=hi) + params["fc1_b"]
    return out.reshape(cfg["batch_size"], oc, h, w)


# ---------------------------------------------------------------------------
# Deterministic parameter construction (shapes from CANDY.__init__).
# ---------------------------------------------------------------------------
def init_params(key, cfg):
    cin, hc, oc = cfg["in_channel"], cfg["hidden_channel"], cfg["out_channel"]
    w, h = cfg["input_size"], cfg["hidden_size"]
    ks = jax.random.split(key, 10)
    wp = jnp.tril(jax.random.normal(ks[0], (h, h), jnp.float32))
    wp = wp - jnp.diag(jnp.diag(wp)) + jnp.eye(h, dtype=jnp.float32)   # diag filled with 1
    return {
        "fc0_w": jax.random.normal(ks[1], (hc, cin), jnp.float32) * 0.1,
        "fc0_b": jax.random.normal(ks[2], (hc,), jnp.float32) * 0.1,
        "p_mask": jax.random.normal(ks[3], (h, w), jnp.float32),
        "Wp": wp,
        "Wp_diag": jnp.ones((h,), jnp.float32),
        "Wzp": jax.random.normal(ks[4], (h, h), jnp.float32) * 0.1,
        "p_lin_w": jax.random.normal(ks[5], (w, w), jnp.float32) * 0.1,
        "p_lin_b": jax.random.normal(ks[6], (w,), jnp.float32) * 0.1,
        "z_lin_w": jax.random.normal(ks[7], (w, w), jnp.float32) * 0.1,
        "z_lin_b": jax.random.normal(ks[8], (w,), jnp.float32) * 0.1,
        "fc1_w": jax.random.normal(ks[9], (oc, hc), jnp.float32) * 0.1,
        "fc1_b": jnp.zeros((oc,), jnp.float32),
    }


if __name__ == "__main__":
    cfg = dict(
        batch_size=1,        # the reference's final .view only works for batch_size == 1
        in_channel=4,
        hidden_channel=8,
        out_channel=4,
        input_size=16,
        hidden_size=16,
    )

    key = jax.random.PRNGKey(0)
    k_x, k_p = jax.random.split(key)
    x = jax.random.normal(
        k_x,
        (cfg["batch_size"], cfg["in_channel"], cfg["hidden_size"], cfg["input_size"]),
        jnp.float32,
    )
    params = init_params(k_p, cfg)

    prep = prepare_candy(params, cfg)           # one-time weight restructuring
    fwd = jax.jit(lambda xx: candy_forward(xx, prep, cfg))

    out, origin = fwd(x)
    jax.block_until_ready(out)
    jax.block_until_ready(origin)

    ref = candy_reference(x, params, cfg)
    np.testing.assert_allclose(np.asarray(out), np.asarray(ref), rtol=5e-3, atol=5e-3)

    assert out.shape == (cfg["batch_size"], cfg["out_channel"],
                         cfg["hidden_size"], cfg["input_size"])
    assert origin.shape == x.shape
    print("KERNEL_OK")
</pallas_src>

<mosaic_0001>
module attributes {stable_mosaic.version = 11 : i64} {
  func.func @_candy_fused_kernel(%arg0: memref<16x64xf32, #tpu.memory_space<vmem>>, %arg1: memref<64x128xf32, #tpu.memory_space<vmem>>, %arg2: memref<1x128xf32, #tpu.memory_space<vmem>>, %arg3: memref<16x128xf32, #tpu.memory_space<vmem>>, %arg4: memref<16x16xf32, #tpu.memory_space<vmem>>, %arg5: memref<16x16xf32, #tpu.memory_space<vmem>>, %arg6: memref<128x128xf32, #tpu.memory_space<vmem>>, %arg7: memref<1x128xf32, #tpu.memory_space<vmem>>, %arg8: memref<128x128xf32, #tpu.memory_space<vmem>>, %arg9: memref<1x128xf32, #tpu.memory_space<vmem>>, %arg10: memref<128x64xf32, #tpu.memory_space<vmem>>, %arg11: memref<1x64xf32, #tpu.memory_space<vmem>>, %arg12: memref<16x64xf32, #tpu.memory_space<vmem>>) attributes {dimension_semantics = [], scalar_prefetch = 0 : i64, scratch_operands = 0 : i64, tpu.core_type = #tpu.core_type<tc>} {
    %c0 = arith.constant 0 : index
    %c0_0 = arith.constant 0 : index
    %0 = vector.load %arg0[%c0, %c0_0] : memref<16x64xf32, #tpu.memory_space<vmem>>, vector<16x64xf32>
    %c0_1 = arith.constant 0 : index
    %c0_2 = arith.constant 0 : index
    %1 = vector.load %arg1[%c0_1, %c0_2] : memref<64x128xf32, #tpu.memory_space<vmem>>, vector<64x128xf32>
    %cst = arith.constant dense<0.000000e+00> : vector<16x128xf32>
    %2 = tpu.matmul %0, %1, %cst {dimension_numbers = #tpu.dot_dimension_numbers<[1], [0], [0], [1], [0, 0, 1, 1], [], []>} : vector<16x64xf32>, vector<64x128xf32>, vector<16x128xf32> -> vector<16x128xf32>
    %c0_3 = arith.constant 0 : index
    %c0_4 = arith.constant 0 : index
    %3 = vector.load %arg2[%c0_3, %c0_4] : memref<1x128xf32, #tpu.memory_space<vmem>>, vector<1x128xf32>
    %4 = vector.broadcast %3 : vector<1x128xf32> to vector<16x128xf32>
    %5 = arith.addf %2, %4 : vector<16x128xf32>
    %c0_5 = arith.constant 0 : index
    %c0_6 = arith.constant 0 : index
    %6 = vector.load %arg3[%c0_5, %c0_6] : memref<16x128xf32, #tpu.memory_space<vmem>>, vector<16x128xf32>
    %7 = arith.mulf %5, %6 : vector<16x128xf32>
    %c0_7 = arith.constant 0 : index
    %c0_8 = arith.constant 0 : index
    %8 = vector.load %arg4[%c0_7, %c0_8] : memref<16x16xf32, #tpu.memory_space<vmem>>, vector<16x16xf32>
    %cst_9 = arith.constant dense<0.000000e+00> : vector<16x128xf32>
    %9 = tpu.matmul %8, %7, %cst_9 {dimension_numbers = #tpu.dot_dimension_numbers<[1], [0], [0], [1], [0, 0, 1, 1], [], []>} : vector<16x16xf32>, vector<16x128xf32>, vector<16x128xf32> -> vector<16x128xf32>
    %cst_10 = arith.constant 1.000000e+00 : f32
    %10 = vector.broadcast %cst_10 : f32 to vector<16x128xf32>
    %11 = arith.addf %9, %10 : vector<16x128xf32>
    %12 = math.absf %11 : vector<16x128xf32>
    %cst_11 = arith.constant 1.000000e+00 : f32
    %13 = vector.broadcast %cst_11 : f32 to vector<16x128xf32>
    %14 = arith.subf %9, %13 : vector<16x128xf32>
    %15 = math.absf %14 : vector<16x128xf32>
    %16 = arith.subf %12, %15 : vector<16x128xf32>
    %cst_12 = arith.constant 5.000000e-01 : f32
    %17 = vector.broadcast %cst_12 : f32 to vector<16x128xf32>
    %18 = arith.mulf %16, %17 : vector<16x128xf32>
    %c0_13 = arith.constant 0 : index
    %c0_14 = arith.constant 0 : index
    %19 = vector.load %arg6[%c0_13, %c0_14] : memref<128x128xf32, #tpu.memory_space<vmem>>, vector<128x128xf32>
    %cst_15 = arith.constant dense<0.000000e+00> : vector<16x128xf32>
    %20 = tpu.matmul %18, %19, %cst_15 {dimension_numbers = #tpu.dot_dimension_numbers<[1], [0], [0], [1], [0, 0, 1, 1], [], []>} : vector<16x128xf32>, vector<128x128xf32>, vector<16x128xf32> -> vector<16x128xf32>
    %c0_16 = arith.constant 0 : index
    %c0_17 = arith.constant 0 : index
    %21 = vector.load %arg7[%c0_16, %c0_17] : memref<1x128xf32, #tpu.memory_space<vmem>>, vector<1x128xf32>
    %22 = vector.broadcast %21 : vector<1x128xf32> to vector<16x128xf32>
    %23 = arith.addf %20, %22 : vector<16x128xf32>
    %cst_18 = arith.constant 1.000000e+00 : f32
    %24 = vector.broadcast %cst_18 : f32 to vector<16x128xf32>
    %25 = arith.addf %23, %24 : vector<16x128xf32>
    %26 = math.absf %25 : vector<16x128xf32>
    %cst_19 = arith.constant 1.000000e+00 : f32
    %27 = vector.broadcast %cst_19 : f32 to vector<16x128xf32>
    %28 = arith.subf %23, %27 : vector<16x128xf32>
    %29 = math.absf %28 : vector<16x128xf32>
    %30 = arith.subf %26, %29 : vector<16x128xf32>
    %cst_20 = arith.constant 5.000000e-01 : f32
    %31 = vector.broadcast %cst_20 : f32 to vector<16x128xf32>
    %32 = arith.mulf %30, %31 : vector<16x128xf32>
    %c0_21 = arith.constant 0 : index
    %c0_22 = arith.constant 0 : index
    %33 = vector.load %arg5[%c0_21, %c0_22] : memref<16x16xf32, #tpu.memory_space<vmem>>, vector<16x16xf32>
    %cst_23 = arith.constant dense<0.000000e+00> : vector<16x128xf32>
    %34 = tpu.matmul %33, %32, %cst_23 {dimension_numbers = #tpu.dot_dimension_numbers<[1], [0], [0], [1], [0, 0, 1, 1], [], []>} : vector<16x16xf32>, vector<16x128xf32>, vector<16x128xf32> -> vector<16x128xf32>
    %cst_24 = arith.constant 1.000000e+00 : f32
    %35 = vector.broadcast %cst_24 : f32 to vector<16x128xf32>
    %36 = arith.addf %34, %35 : vector<16x128xf32>
    %37 = math.absf %36 : vector<16x128xf32>
    %cst_25 = arith.constant 1.000000e+00 : f32
    %38 = vector.broadcast %cst_25 : f32 to vector<16x128xf32>
    %39 = arith.subf %34, %38 : vector<16x128xf32>
    %40 = math.absf %39 : vector<16x128xf32>
    %41 = arith.subf %37, %40 : vector<16x128xf32>
    %cst_26 = arith.constant 5.000000e-01 : f32
    %42 = vector.broadcast %cst_26 : f32 to vector<16x128xf32>
    %43 = arith.mulf %41, %42 : vector<16x128xf32>
    %c0_27 = arith.constant 0 : index
    %c0_28 = arith.constant 0 : index
    %44 = vector.load %arg8[%c0_27, %c0_28] : memref<128x128xf32, #tpu.memory_space<vmem>>, vector<128x128xf32>
    %cst_29 = arith.constant dense<0.000000e+00> : vector<16x128xf32>
    %45 = tpu.matmul %43, %44, %cst_29 {dimension_numbers = #tpu.dot_dimension_numbers<[1], [0], [0], [1], [0, 0, 1, 1], [], []>} : vector<16x128xf32>, vector<128x128xf32>, vector<16x128xf32> -> vector<16x128xf32>
    %c0_30 = arith.constant 0 : index
    %c0_31 = arith.constant 0 : index
    %46 = vector.load %arg9[%c0_30, %c0_31] : memref<1x128xf32, #tpu.memory_space<vmem>>, vector<1x128xf32>
    %47 = vector.broadcast %46 : vector<1x128xf32> to vector<16x128xf32>
    %48 = arith.addf %45, %47 : vector<16x128xf32>
    %cst_32 = arith.constant 1.000000e+00 : f32
    %49 = vector.broadcast %cst_32 : f32 to vector<16x128xf32>
    %50 = arith.addf %48, %49 : vector<16x128xf32>
    %51 = math.absf %50 : vector<16x128xf32>
    %cst_33 = arith.constant 1.000000e+00 : f32
    %52 = vector.broadcast %cst_33 : f32 to vector<16x128xf32>
    %53 = arith.subf %48, %52 : vector<16x128xf32>
    %54 = math.absf %53 : vector<16x128xf32>
    %55 = arith.subf %51, %54 : vector<16x128xf32>
    %cst_34 = arith.constant 5.000000e-01 : f32
    %56 = vector.broadcast %cst_34 : f32 to vector<16x128xf32>
    %57 = arith.mulf %55, %56 : vector<16x128xf32>
    %58 = arith.addf %32, %57 : vector<16x128xf32>
    %c0_35 = arith.constant 0 : index
    %c0_36 = arith.constant 0 : index
    %59 = vector.load %arg10[%c0_35, %c0_36] : memref<128x64xf32, #tpu.memory_space<vmem>>, vector<128x64xf32>
    %cst_37 = arith.constant dense<0.000000e+00> : vector<16x64xf32>
    %60 = tpu.matmul %58, %59, %cst_37 {dimension_numbers = #tpu.dot_dimension_numbers<[1], [0], [0], [1], [0, 0, 1, 1], [], []>} : vector<16x128xf32>, vector<128x64xf32>, vector<16x64xf32> -> vector<16x64xf32>
    %c0_38 = arith.constant 0 : index
    %c0_39 = arith.constant 0 : index
    %61 = vector.load %arg11[%c0_38, %c0_39] : memref<1x64xf32, #tpu.memory_space<vmem>>, vector<1x64xf32>
    %62 = vector.broadcast %61 : vector<1x64xf32> to vector<16x64xf32>
    %63 = arith.addf %60, %62 : vector<16x64xf32>
    %c0_40 = arith.constant 0 : index
    %c0_41 = arith.constant 0 : index
    %64 = vector.load %arg12[%c0_40, %c0_41] : memref<16x64xf32, #tpu.memory_space<vmem>>, vector<16x64xf32>
    tpu.vector_store %arg12[%c0_40, %c0_41], %63 {strides = array<i32>} : memref<16x64xf32, #tpu.memory_space<vmem>>, vector<16x64xf32>,
    return
  }
}

</mosaic_0001>

<bundles_post_ra>
// kernel: _lambda_.1
= control target key start
LH: loop header
LB: loop body
LE: loop exit
PB: predicated region body
PF: predicated region fallthrough
CT: control target
= control target key end

     0   :  { %vm58_vm0 = vcmask 523264   ;;  %vm146_vm1 = vcmask 130048   ;;  %s1300_s1 = inlined_call_operand.vmem [shape: f32[64,128], index: 1, kind: input, shape index: {}]   ;;  %s1301_s0 = inlined_call_operand.vmem [shape: f32[16,64], index: 0, kind: input, shape index: {}]   ;;  %s1302_s4 = inlined_call_operand.vmem [shape: f32[16,16], index: 4, kind: input, shape index: {}]   ;;  %s1303_s6 = inlined_call_operand.vmem [shape: f32[128,128], index: 6, kind: input, shape index: {}]   ;;  %s1304_s2 = inlined_call_operand.vmem [shape: f32[1,128], index: 2, kind: input, shape index: {}]   ;;  %s1305_s3 = inlined_call_operand.vmem [shape: f32[16,128], index: 3, kind: input, shape index: {}]   ;;  %s1306_s5 = inlined_call_operand.vmem [shape: f32[16,16], index: 5, kind: input, shape index: {}]   ;;  %s1307_s7 = inlined_call_operand.vmem [shape: f32[1,128], index: 7, kind: input, shape index: {}]   ;;  %s1308_s8 = inlined_call_operand.vmem [shape: f32[128,128], index: 8, kind: input, shape index: {}]   ;;  %s1309_s10 = inlined_call_operand.vmem [shape: f32[128,64], index: 10, kind: input, shape index: {}]   ;;  %s1310_s9 = inlined_call_operand.vmem [shape: f32[1,128], index: 9, kind: input, shape index: {}]   ;;  %s1311_s11 = inlined_call_operand.vmem [shape: f32[1,64], index: 11, kind: input, shape index: {}]   ;;  %s1312_s12 = inlined_call_operand.vmem [shape: f32[16,64], index: 12, kind: output, shape index: {}]  }
   0x1   :  { %v43_v0 = vld [vmem:[%s1300_s1] sm:$0xff]  ;;  %v44_v1 = vld [vmem:[%s1300_s1 + $0x8] sm:$0xff]  ;;  %v45_v2 = vld [vmem:[%s1300_s1 + $0x10] sm:$0xff] }
   0x2   :  { %v889_v3 = vpack.c.bf16 %v44_v1, %v43_v0  ;;  %v46_v4 = vld [vmem:[%s1300_s1 + $0x18] sm:$0xff]  ;;  %v47_v6 = vld [vmem:[%s1300_s1 + $0x20] sm:$0xff]  ;;  %v48_v7 = vld [vmem:[%s1300_s1 + $0x28] sm:$0xff] }
   0x3   :  { %v893_v5 = vpack.c.bf16 %v46_v4, %v45_v2  ;;  %v41_v8 = vld [vmem:[%s1301_s0] sm:$0xff]  ;;  %v897_v9 = vpack.c.bf16 %v48_v7, %v47_v6  ;;  %v49_v10 = vld [vmem:[%s1300_s1 + $0x30] sm:$0xff]  ;;  %v50_v11 = vld [vmem:[%s1300_s1 + $0x38] sm:$0xff] }
   0x4   :  { %890 = vmatprep.subr.bf16.mxu0 %v889_v3  ;;  %767 = vmatprep.mubr.msk.f32.mxu0 %vm58_vm0, %v41_v8  ;;  %v901_v12 = vpack.c.bf16 %v50_v11, %v49_v10  ;;  %v42_v13 = vld [vmem:[%s1301_s0 + $0x8] sm:$0xff]  ;;  %v144_v14 = vld [vmem:[%s1302_s4] sm:$0xff]  ;;  %v242_v17 = vld [vmem:[%s1303_s6 + $0x10] sm:$0xff] }
   0x5   :  { %892 = vmatpush3.bf16.msra.mxu0 %v889_v3  ;;  %v240_v15 = vld [vmem:[%s1303_s6] sm:$0xff]  ;;  %v241_v16 = vld [vmem:[%s1303_s6 + $0x8] sm:$0xff]  ;;  %v243_v19 = vld [vmem:[%s1303_s6 + $0x18] sm:$0xff] }
   0x6   :  { %894 = vmatprep.subr.bf16.mxu0 %v893_v5  ;;  %v909_v18 = vpack.c.bf16 %v241_v16, %v240_v15  ;;  %v913_v20 = vpack.c.bf16 %v243_v19, %v242_v17  ;;  %v244_v21 = vld [vmem:[%s1303_s6 + $0x20] sm:$0xff]  ;;  %v245_v22 = vld [vmem:[%s1303_s6 + $0x28] sm:$0xff]  ;;  %v246_v24 = vld [vmem:[%s1303_s6 + $0x30] sm:$0xff] }
   0x7   :  { %v917_v23 = vpack.c.bf16 %v245_v22, %v244_v21  ;;  %v247_v25 = vld [vmem:[%s1303_s6 + $0x38] sm:$0xff]  ;;  %v248_v27 = vld [vmem:[%s1303_s6 + $0x40] sm:$0xff]  ;;  %v249_v28 = vld [vmem:[%s1303_s6 + $0x48] sm:$0xff] }
   0x8   :  { %910 = vmatprep.subr.bf16.mxu1 %v909_v18  ;;  %v921_v26 = vpack.c.bf16 %v247_v25, %v246_v24  ;;  %v925_v29 = vpack.c.bf16 %v249_v28, %v248_v27  ;;  %v250_v30 = vld [vmem:[%s1303_s6 + $0x50] sm:$0xff]  ;;  %v251_v31 = vld [vmem:[%s1303_s6 + $0x58] sm:$0xff]  ;;  %v661_v33 = vld [vmem:[%s1304_s2] ss:$0 sm:$0xff] }
   0x9   :  { %896 = vmatpush3.bf16.msra.mxu0 %v893_v5  ;;  %912 = vmatpush3.bf16.msra.mxu1 %v909_v18  ;;  %v929_v32 = vpack.c.bf16 %v251_v31, %v250_v30  ;;  %v141_v35 = vld [vmem:[%s1305_s3 + $0x8] sm:$0xff]  ;;  %v140_v38 = vld [vmem:[%s1305_s3] sm:$0xff]  ;;  %v254_v47 = vld [vmem:[%s1303_s6 + $0x70] sm:$0xff] }
   0xa   :  { %898 = vmatprep.subr.bf16.mxu0 %v897_v9  ;;  %914 = vmatprep.subr.bf16.mxu1 %v913_v20  ;;  %v145_v43 = vld [vmem:[%s1302_s4 + $0x8] sm:$0xff]  ;;  %v252_v44 = vld [vmem:[%s1303_s6 + $0x60] sm:$0xff]  ;;  %v255_v48 = vld [vmem:[%s1303_s6 + $0x78] sm:$0xff] }
   0xb   :  { %v253_v45 = vld [vmem:[%s1303_s6 + $0x68] sm:$0xff]  ;;  %v937_v49 = vpack.c.bf16 %v255_v48, %v254_v47  ;;  %v350_v0 = vld [vmem:[%s1306_s5] sm:$0xff]  ;;  %v447_v22 = vld [vmem:[%s1308_s8 + $0x10] sm:$0xff] }
   0xc   :  { %v933_v46 = vpack.c.bf16 %v253_v45, %v252_v44  ;;  %v668_v1 = vld [vmem:[%s1307_s7] ss:$0 sm:$0xff]  ;;  %v446_v18 = vld [vmem:[%s1308_s8 + $0x8] sm:$0xff]  ;;  %v452_v30 = vld [vmem:[%s1308_s8 + $0x38] sm:$0xff] }
   0xd   :  { %900 = vmatpush3.bf16.msra.mxu0 %v897_v9  ;;  %916 = vmatpush3.bf16.msra.mxu1 %v913_v20  ;;  %v445_v17 = vld [vmem:[%s1308_s8] sm:$0xff]  ;;  %v351_v24 = vld [vmem:[%s1306_s5 + $0x8] sm:$0xff]  ;;  %v560_v48 = vld [vmem:[%s1309_s10 + $0x18] sm:$0xff] }
   0xe   :  { %902 = vmatprep.subr.bf16.mxu0 %v901_v12  ;;  %918 = vmatprep.subr.bf16.mxu1 %v917_v23  ;;  %v945_v21 = vpack.c.bf16 %v446_v18, %v445_v17  ;;  %v450_v27 = vld [vmem:[%s1308_s8 + $0x28] sm:$0xff]  ;;  %v557_v44 = vld [vmem:[%s1309_s10] sm:$0xff]  ;;  %v572_v17 = vld [vmem:[%s1309_s10 + $0x78] sm:$0xff] }
   0xf   :  { %v558_v45 = vld [vmem:[%s1309_s10 + $0x8] sm:$0xff] }
  0x10   :  { %v977_v47 = vpack.c.bf16 %v558_v45, %v557_v44 }
  0x11   :  { %904 = vmatpush3.bf16.msra.mxu0 %v901_v12  ;;  %920 = vmatpush3.bf16.msra.mxu1 %v917_v23  ;;  %v448_v23 = vld [vmem:[%s1308_s8 + $0x18] sm:$0xff] }
  0x12   :  { %922 = vmatprep.subr.bf16.mxu1 %v921_v26  ;;  %v949_v25 = vpack.c.bf16 %v448_v23, %v447_v22 }
  0x14   :  { %768 = vmatmul.mubr.msk.f32.vlgmr.msra.gmra.mrb[0].mxu0 %vm58_vm0, %v42_v13 }
  0x15   :  { %774 = vmatprep.mubr.msk.f32.mxu0 %vm146_vm1, %v144_v14  ;;  %924 = vmatpush3.bf16.msra.mxu1 %v921_v26  ;;  %v449_v26 = vld [vmem:[%s1308_s8 + $0x20] sm:$0xff] }
  0x16   :  { %926 = vmatprep.subr.bf16.mxu1 %v925_v29  ;;  %v953_v28 = vpack.c.bf16 %v450_v27, %v449_v26 }
  0x19   :  { %928 = vmatpush3.bf16.msra.mxu1 %v925_v29  ;;  %v451_v29 = vld [vmem:[%s1308_s8 + $0x30] sm:$0xff] }
  0x1a   :  { %930 = vmatprep.subr.bf16.mxu1 %v929_v32  ;;  %v957_v31 = vpack.c.bf16 %v452_v30, %v451_v29 }
  0x1d   :  { %932 = vmatpush3.bf16.msra.mxu1 %v929_v32  ;;  %v453_v32 = vld [vmem:[%s1308_s8 + $0x40] sm:$0xff] }
  0x1e   :  { %934 = vmatprep.subr.bf16.mxu1 %v933_v46 }
  0x21   :  { %936 = vmatpush3.bf16.msra.mxu1 %v933_v46  ;;  %v559_v46 = vld [vmem:[%s1309_s10 + $0x10] sm:$0xff] }
  0x22   :  { %938 = vmatprep.subr.bf16.mxu1 %v937_v49 }
  0x25   :  { %940 = vmatpush3.bf16.msra.mxu1 %v937_v49  ;;  %v981_v49 = vpack.c.bf16 %v560_v48, %v559_v46 }
  0x26   :  { %978 = vmatprep.subr.bf16.mxu1 %v977_v47 }
  0xe7   :  { %v769_v34 = vpop.f32.mrb[0].mxu0 }
  0xe8   :  { %v137_v36 = vadd.f32 %v769_v34, %v661_v33  ;;  %v131_v37 = vpop.f32.mrb[1].mxu0 }
  0xe9   :  { %v132_v39 = vadd.f32 %v661_v33, %v131_v37  ;;  %v454_v33 = vld [vmem:[%s1308_s8 + $0x48] sm:$0xff] }
  0xea   :  { %v143_v40 = vmul.f32 %v141_v35, %v137_v36  ;;  %v961_v34 = vpack.c.bf16 %v454_v33, %v453_v32  ;;  %v455_v35 = vld [vmem:[%s1308_s8 + $0x50] sm:$0xff]  ;;  %v456_v36 = vld [vmem:[%s1308_s8 + $0x58] sm:$0xff] }
  0xeb   :  { %v142_v41 = vmul.f32 %v140_v38, %v132_v39  ;;  %v965_v37 = vpack.c.bf16 %v456_v36, %v455_v35  ;;  %v457_v38 = vld [vmem:[%s1308_s8 + $0x60] sm:$0xff]  ;;  %v458_v39 = vld [vmem:[%s1308_s8 + $0x68] sm:$0xff] }
  0xed   :  { %v905_v42 = vpack.c.bf16 %v143_v40, %v142_v41  ;;  %v969_v40 = vpack.c.bf16 %v458_v39, %v457_v38  ;;  %v459_v41 = vld [vmem:[%s1308_s8 + $0x70] sm:$0xff]  ;;  %v678_v39 = vld [vmem:[%s1311_s11] ss:$0 sm:$0xff] }
  0xef   :  { %906 = vmatprep.subr.bf16.mxu0 %v905_v42 }
  0xf0   :  { %908 = vmatpush3.bf16.msra.mxu0 %v905_v42  ;;  %v460_v42 = vld [vmem:[%s1308_s8 + $0x78] sm:$0xff] }
  0xf3   :  { %775 = vmatmul.mubr.msk.f32.vlgmr.msra.gmra.mrb[2].mxu0 %vm146_vm1, %v145_v43  ;;  %v973_v43 = vpack.c.bf16 %v460_v42, %v459_v41 }
  0xf4   :  { %816 = vmatprep.mubr.msk.f32.mxu0 %vm146_vm1, %v350_v0 }
 0x1c6   :  { %v776_v50 = vpop.f32.mrb[2].mxu0 }
 0x1c7   :  { %v229_v51 = vadd.f32 1.0, %v776_v50  ;;  %v667_v52 = vadd.f32 -1.0, %v776_v50  ;;  %v219_v53 = vpop.f32.mrb[3].mxu0  ;;  %v561_v50 = vld [vmem:[%s1309_s10 + $0x20] sm:$0xff] }
 0x1c8   :  { %v228_v54 = vadd.f32 1.0, %v219_v53  ;;  %v666_v55 = vadd.f32 -1.0, %v219_v53  ;;  %v563_v53 = vld [vmem:[%s1309_s10 + $0x30] sm:$0xff] }
 0x1c9   :  { %v231_v56 = vand.u32 2147483647, %v229_v51  ;;  %v235_v57 = vand.u32 2147483647, %v667_v52  ;;  %v562_v51 = vld [vmem:[%s1309_s10 + $0x28] sm:$0xff] }
 0x1ca   :  { %v230_v58 = vand.u32 2147483647, %v228_v54  ;;  %v234_v59 = vand.u32 2147483647, %v666_v55  ;;  %v985_v52 = vpack.c.bf16 %v562_v51, %v561_v50  ;;  %v564_v54 = vld [vmem:[%s1309_s10 + $0x38] sm:$0xff] }
 0x1cb   :  { %v237_v60 = vsub.f32 %v231_v56, %v235_v57  ;;  %v989_v55 = vpack.c.bf16 %v564_v54, %v563_v53  ;;  %v565_v56 = vld [vmem:[%s1309_s10 + $0x40] sm:$0xff]  ;;  %v566_v57 = vld [vmem:[%s1309_s10 + $0x48] sm:$0xff] }
 0x1cc   :  { %v236_v61 = vsub.f32 %v230_v58, %v234_v59  ;;  %v993_v58 = vpack.c.bf16 %v566_v57, %v565_v56 }
 0x1cd   :  { %v239_v63 = vmul.f32 0.5, %v237_v60 }
 0x1ce   :  { %v238_v62 = vmul.f32 0.5, %v236_v61 }
 0x1d0   :  { %809 = vmatprep.mubr.f32.mxu1 %v238_v62 }
 0x1d1   :  { %810 = vmatmul.mubr.f32.vlgmr.msra.gmra.mrb[0].mxu1 %v239_v63 }
 0x1d2   :  { %980 = vmatpush3.bf16.msra.mxu1 %v977_v47 }
 0x1d3   :  { %982 = vmatprep.subr.bf16.mxu1 %v981_v49 }
 0x1d6   :  { %984 = vmatpush3.bf16.msra.mxu1 %v981_v49 }
 0x1d7   :  { %986 = vmatprep.subr.bf16.mxu1 %v985_v52 }
 0x1da   :  { %988 = vmatpush3.bf16.msra.mxu1 %v985_v52 }
 0x1db   :  { %990 = vmatprep.subr.bf16.mxu1 %v989_v55 }
 0x1de   :  { %992 = vmatpush3.bf16.msra.mxu1 %v989_v55 }
 0x1df   :  { %994 = vmatprep.subr.bf16.mxu1 %v993_v58 }
 0x1e2   :  { %996 = vmatpush3.bf16.msra.mxu1 %v993_v58 }
 0x2a4   :  { %v811_v2 = vpop.f32.mrb[0].mxu1 }
 0x2a5   :  { %v335_v3 = vadd.f32 %v811_v2, %v668_v1  ;;  %v329_v4 = vpop.f32.mrb[1].mxu1 }
 0x2a6   :  { %v330_v5 = vadd.f32 %v668_v1, %v329_v4 }
 0x2a7   :  { %v339_v6 = vadd.f32 1.0, %v335_v3  ;;  %v670_v7 = vadd.f32 -1.0, %v335_v3 }
 0x2a8   :  { %v338_v8 = vadd.f32 1.0, %v330_v5  ;;  %v669_v9 = vadd.f32 -1.0, %v330_v5 }
 0x2a9   :  { %v341_v10 = vand.u32 2147483647, %v339_v6  ;;  %v345_v11 = vand.u32 2147483647, %v670_v7 }
 0x2aa   :  { %v340_v12 = vand.u32 2147483647, %v338_v8  ;;  %v344_v13 = vand.u32 2147483647, %v669_v9  ;;  %v567_v9 = vld [vmem:[%s1309_s10 + $0x50] sm:$0xff] }
 0x2ab   :  { %v347_v14 = vsub.f32 %v341_v10, %v345_v11  ;;  %v568_v10 = vld [vmem:[%s1309_s10 + $0x58] sm:$0xff] }
 0x2ac   :  { %v346_v15 = vsub.f32 %v340_v12, %v344_v13  ;;  %v997_v11 = vpack.c.bf16 %v568_v10, %v567_v9  ;;  %v569_v12 = vld [vmem:[%s1309_s10 + $0x60] sm:$0xff]  ;;  %v570_v13 = vld [vmem:[%s1309_s10 + $0x68] sm:$0xff] }
 0x2ad   :  { %v1178_v16 = vmul.f32 0.5, %v347_v14  ;;  %v1001_v14 = vpack.c.bf16 %v570_v13, %v569_v12 }
 0x2ae   :  { %v1186_v19 = vmul.f32 0.5, %v346_v15  ;;  %998 = vmatprep.subr.bf16.mxu1 %v997_v11  ;;  %v571_v15 = vld [vmem:[%s1309_s10 + $0x70] sm:$0xff] }
 0x2af   :  { %1000 = vmatpush3.bf16.msra.mxu1 %v997_v11  ;;  %v1005_v18 = vpack.c.bf16 %v572_v17, %v571_v15 }
 0x2b0   :  { %v941_v20 = vpack.c.bf16 %v1178_v16, %v1186_v19  ;;  %1002 = vmatprep.subr.bf16.mxu1 %v1001_v14 }
 0x2b2   :  { %942 = vmatprep.subr.bf16.mxu0 %v941_v20 }
 0x2b3   :  { %944 = vmatpush3.bf16.msra.mxu0 %v941_v20  ;;  %1004 = vmatpush3.bf16.msra.mxu1 %v1001_v14  ;;  %v675_v20 = vld [vmem:[%s1310_s9] ss:$0 sm:$0xff] }
 0x2b4   :  { %946 = vmatprep.subr.bf16.mxu0 %v945_v21  ;;  %1006 = vmatprep.subr.bf16.mxu1 %v1005_v18 }
 0x2b6   :  { %817 = vmatmul.mubr.msk.f32.vlgmr.msra.gmra.mrb[4].mxu0 %vm146_vm1, %v351_v24 }
 0x2b7   :  { %948 = vmatpush3.bf16.msra.mxu0 %v945_v21  ;;  %1008 = vmatpush3.bf16.msra.mxu1 %v1005_v18 }
 0x2b8   :  { %950 = vmatprep.subr.bf16.mxu0 %v949_v25 }
 0x2bb   :  { %952 = vmatpush3.bf16.msra.mxu0 %v949_v25 }
 0x2bc   :  { %954 = vmatprep.subr.bf16.mxu0 %v953_v28 }
 0x2bf   :  { %956 = vmatpush3.bf16.msra.mxu0 %v953_v28 }
 0x2c0   :  { %958 = vmatprep.subr.bf16.mxu0 %v957_v31 }
 0x2c3   :  { %960 = vmatpush3.bf16.msra.mxu0 %v957_v31 }
 0x2c4   :  { %962 = vmatprep.subr.bf16.mxu0 %v961_v34 }
 0x2c7   :  { %964 = vmatpush3.bf16.msra.mxu0 %v961_v34 }
 0x2c8   :  { %966 = vmatprep.subr.bf16.mxu0 %v965_v37 }
 0x2cb   :  { %968 = vmatpush3.bf16.msra.mxu0 %v965_v37 }
 0x2cc   :  { %970 = vmatprep.subr.bf16.mxu0 %v969_v40 }
 0x2cf   :  { %972 = vmatpush3.bf16.msra.mxu0 %v969_v40 }
 0x2d0   :  { %974 = vmatprep.subr.bf16.mxu0 %v973_v43 }
 0x2d3   :  { %976 = vmatpush3.bf16.msra.mxu0 %v973_v43 }
 0x389   :  { %v818_v59 = vpop.f32.mrb[4].mxu0 }
 0x38a   :  { %v434_v60 = vadd.f32 1.0, %v818_v59  ;;  %v674_v61 = vadd.f32 -1.0, %v818_v59  ;;  %v424_v62 = vpop.f32.mrb[5].mxu0 }
 0x38b   :  { %v433_v63 = vadd.f32 1.0, %v424_v62  ;;  %v673_v0 = vadd.f32 -1.0, %v424_v62 }
 0x38c   :  { %v436_v1 = vand.u32 2147483647, %v434_v60  ;;  %v440_v2 = vand.u32 2147483647, %v674_v61 }
 0x38d   :  { %v435_v3 = vand.u32 2147483647, %v433_v63  ;;  %v439_v4 = vand.u32 2147483647, %v673_v0 }
 0x38e   :  { %v442_v5 = vsub.f32 %v436_v1, %v440_v2 }
 0x38f   :  { %v441_v6 = vsub.f32 %v435_v3, %v439_v4 }
 0x390   :  { %v444_v8 = vmul.f32 0.5, %v442_v5 }
 0x391   :  { %v443_v7 = vmul.f32 0.5, %v441_v6 }
 0x393   :  { %851 = vmatprep.mubr.f32.mxu0 %v443_v7 }
 0x394   :  { %852 = vmatmul.mubr.f32.vlgmr.msra.gmra.mrb[6].mxu0 %v444_v8 }
 0x467   :  { %v853_v21 = vpop.f32.mrb[6].mxu0 }
 0x468   :  { %v540_v22 = vadd.f32 %v853_v21, %v675_v20  ;;  %v534_v23 = vpop.f32.mrb[7].mxu0 }
 0x469   :  { %v535_v24 = vadd.f32 %v675_v20, %v534_v23 }
 0x46a   :  { %v544_v25 = vadd.f32 1.0, %v540_v22  ;;  %v677_v26 = vadd.f32 -1.0, %v540_v22 }
 0x46b   :  { %v543_v27 = vadd.f32 1.0, %v535_v24  ;;  %v676_v28 = vadd.f32 -1.0, %v535_v24 }
 0x46c   :  { %v546_v29 = vand.u32 2147483647, %v544_v25  ;;  %v550_v30 = vand.u32 2147483647, %v677_v26 }
 0x46d   :  { %v545_v31 = vand.u32 2147483647, %v543_v27  ;;  %v549_v32 = vand.u32 2147483647, %v676_v28 }
 0x46e   :  { %v552_v33 = vsub.f32 %v546_v29, %v550_v30 }
 0x46f   :  { %v551_v34 = vsub.f32 %v545_v31, %v549_v32 }
 0x470   :  { %v554_v35 = vmul.f32 0.5, %v552_v33 }
 0x471   :  { %v553_v36 = vmul.f32 0.5, %v551_v34 }
 0x472   :  { %v556_v38 = vadd.f32 %v554_v35, %v1178_v16 }
 0x473   :  { %v555_v37 = vadd.f32 %v553_v36, %v1186_v19 }
 0x475   :  { %886 = vmatprep.mubr.f32.mxu1 %v555_v37 }
 0x476   :  { %887 = vmatmul.mubr.f32.vlgmr.msra.gmra.mrb[2].mxu1 %v556_v38 }
 0x549   :  { %v888_v40 = vpop.f32.mrb[2].mxu1 }
 0x54a   :  { %v652_v41 = vadd.f32 %v888_v40, %v678_v39  ;;  %v646_v42 = vpop.f32.mrb[3].mxu1 }
 0x54b   :  { %v647_v43 = vadd.f32 %v678_v39, %v646_v42 }
 0x54c   :  { %656 = vst.msk [vmem:[%s1312_s12 + $0x8] sm:$0xff] %vm58_vm0, %v652_v41 }
 0x54d   :  { %655 = vst.msk [vmem:[%s1312_s12] sm:$0xff] %vm58_vm0, %v647_v43 }

</bundles_post_ra>
